<compile_context>
chip_gen: v7x
topology: tpu7x:2x2x1
jax: 0.10.0
libtpu: 0.0.40
codegen_flags: <defaults>
</compile_context>

<pallas_src>
import functools

import numpy as np
import jax
import jax.numpy as jnp
from jax.experimental import pallas as pl
from jax.experimental.pallas import tpu as pltpu


def _wavepool_kernel(x_ref, ml_ref, mh_ref, ll_ref, lh_ref, hl_ref, hh_ref,
                     *, we, n_split):
    """One row block: each input row is [even image row | odd image row] (2*we wide)."""
    f32 = jnp.float32
    row0 = x_ref[:, pl.ds(0, we)].astype(f32)    # even rows   (tb, we)
    row1 = x_ref[:, pl.ds(we, we)].astype(f32)   # odd rows    (tb, we)
    s = row0 + row1                              # vertical low-pass  (VPU)
    d = row1 - row0                              # vertical high-pass (VPU)

    def bf16_parts(v):
        # Error-free (for 16-bit inputs) / ~2^-25-accurate (for f32 inputs)
        # decomposition of v into bf16 pieces; the +-0.5 weights are exact in
        # bf16, so f32-accurate results come out of plain bf16 MXU passes.
        hi = v.astype(jnp.bfloat16)
        parts = [hi]
        if n_split >= 2:
            r = v - hi.astype(f32)
            mid = r.astype(jnp.bfloat16)
            parts.append(mid)
            if n_split >= 3:
                parts.append((r - mid.astype(f32)).astype(jnp.bfloat16))
        return parts

    def mdot(parts, m):
        # Sequential accumulation keeps only one partial product live at a time.
        acc = jnp.dot(parts[0], m, preferred_element_type=f32)
        for p in parts[1:]:
            acc = acc + jnp.dot(p, m, preferred_element_type=f32)
        return acc

    s_parts = bf16_parts(s)
    d_parts = bf16_parts(d)
    ml = ml_ref[...]                             # (we, w2): 0.5*(even+odd)
    mh = mh_ref[...]                             # (we, w2): 0.5*(odd-even)

    ll_ref[...] = mdot(s_parts, ml).astype(ll_ref.dtype)
    lh_ref[...] = mdot(s_parts, mh).astype(lh_ref.dtype)
    hl_ref[...] = mdot(d_parts, ml).astype(hl_ref.dtype)
    hh_ref[...] = mdot(d_parts, mh).astype(hh_ref.dtype)


def _haar_matrices(we):
    """Horizontal Haar combine matrices (host-side numpy constants)."""
    w2 = we // 2
    j = np.arange(w2)
    ml = np.zeros((we, w2), np.float32)
    mh = np.zeros((we, w2), np.float32)
    ml[2 * j, j] = 0.5
    ml[2 * j + 1, j] = 0.5
    mh[2 * j, j] = -0.5
    mh[2 * j + 1, j] = 0.5
    return ml, mh


def _pick_tb(r, row_bytes_f32, target_bytes):
    """Row-block size: big streaming tiles, >=2 (ideally even #) grid blocks."""
    if r <= 8:
        return r
    max_tb = (r // 8) * 8
    tb = max(8, (target_bytes // row_bytes_f32) // 8 * 8)
    tb = min(tb, max_tb)
    # At least 2 grid blocks so both v7x TensorCores get work ("parallel" axis).
    if r >= 16 and pl.cdiv(r, tb) < 2:
        half = -(-r // 2)
        tb = min(max_tb, -(-half // 8) * 8)
    # Prefer an even block count when it is cheap to arrange.
    nb = pl.cdiv(r, tb)
    if nb >= 3 and nb % 2 == 1:
        q = -(-r // (nb + 1))
        tb_alt = max(8, -(-q // 8) * 8)
        if tb_alt <= max_tb and pl.cdiv(r, tb_alt) % 2 == 0:
            tb = tb_alt
    return tb


def wavepool(x):
    """Forward of WavePool: x (N,C,H,W) float -> (LL, LH, HL, HH), each (N,C,H//2,W//2)."""
    N, C, H, W = x.shape
    H2, W2 = H // 2, W // 2

    # dtype handling: keep 16-bit floats in native dtype (half the HBM traffic,
    # exact 2-way bf16 split); everything else computes in f32 with a 3-way split.
    if jnp.issubdtype(x.dtype, jnp.floating) and x.dtype.itemsize == 2:
        n_split = 2
    else:
        x = x.astype(jnp.float32)
        n_split = 3
    out_dt = x.dtype

    if H2 == 0 or W2 == 0:
        z = jnp.zeros((N, C, H2, W2), out_dt)
        return z, z, z, z

    # conv2d(kernel=2, stride=2) drops the trailing row/col for odd H/W.
    if (H & 1) or (W & 1):
        x = x[:, :, : 2 * H2, : 2 * W2]

    We = 2 * W2                       # image-row width (even)
    Wd = 2 * We                       # kernel row = [even row | odd row]
    R = N * C * H2                    # one kernel row per 2-row input strip
    x2 = x.reshape(R, Wd)             # free (row-major contiguous) for even H/W

    ml_np, mh_np = _haar_matrices(We)
    ml = jnp.asarray(ml_np, dtype=jnp.bfloat16)   # +-0.5 exact in bf16
    mh = jnp.asarray(mh_np, dtype=jnp.bfloat16)

    # Tile sizing from the actual VMEM capacity (v7x: 64 MiB, v5e/v6e: 128 MiB).
    try:
        vmem_cap = int(pltpu.get_tpu_info().vmem_capacity_bytes)
    except Exception:  # conservative fallback
        vmem_cap = 64 << 20
    target = (6 << 20) if vmem_cap >= (96 << 20) else (3 << 20)
    row_bytes_f32 = Wd * 4
    tb = _pick_tb(R, row_bytes_f32, target)
    grid = (pl.cdiv(R, tb),)

    # Explicit VMEM budget including kernel-internal temporaries:
    #   2x double-buffered input tile, 2x double-buffered output band set,
    #   2x both (tiny) filter matrices, ~7 f32 tiles of in-kernel values
    #   (row0/row1, s/d, bf16 split parts, accumulators) + slack.
    itemsize = x2.dtype.itemsize
    out_itemsize = jnp.dtype(out_dt).itemsize
    in_tile = tb * Wd * itemsize
    out_tile = tb * Wd * out_itemsize          # all four (tb, W2) bands together
    f32_tile = tb * Wd * 4
    m_bytes = 2 * We * W2 * 2
    vmem_limit = 2 * in_tile + 2 * out_tile + 2 * m_bytes + 7 * f32_tile + (2 << 20)
    vmem_limit = int(max(16 << 20,
                         min(vmem_limit, max(vmem_cap - (12 << 20), 16 << 20))))

    kernel = functools.partial(_wavepool_kernel, we=We, n_split=n_split)
    band_shape = jax.ShapeDtypeStruct((R, W2), out_dt)
    band_spec = pl.BlockSpec((tb, W2), lambda i: (i, 0))

    ll, lh, hl, hh = pl.pallas_call(
        kernel,
        out_shape=(band_shape, band_shape, band_shape, band_shape),
        grid=grid,
        in_specs=[
            pl.BlockSpec((tb, Wd), lambda i: (i, 0)),   # streamed row blocks
            pl.BlockSpec((We, W2), lambda i: (0, 0)),   # invariant filter (low)
            pl.BlockSpec((We, W2), lambda i: (0, 0)),   # invariant filter (high)
        ],
        out_specs=(band_spec, band_spec, band_spec, band_spec),
        compiler_params=pltpu.CompilerParams(
            dimension_semantics=("parallel",),          # shards over v7x's 2 TCs
            vmem_limit_bytes=vmem_limit,
        ),
    )(x2, ml, mh)

    shape4 = (N, C, H2, W2)
    return (ll.reshape(shape4), lh.reshape(shape4),
            hl.reshape(shape4), hh.reshape(shape4))


if __name__ == "__main__":
    key = jax.random.PRNGKey(0)
    N, C, H, W = 2, 4, 16, 16
    x = jax.random.normal(key, (N, C, H, W), dtype=jnp.float32)

    outs = jax.block_until_ready(wavepool(x))
    ll, lh, hl, hh = outs

    # Pure-JAX reference = PyTorch depthwise Haar conv2d(kernel=2, stride=2).
    a = x[:, :, 0::2, 0::2]
    b = x[:, :, 0::2, 1::2]
    c = x[:, :, 1::2, 0::2]
    d = x[:, :, 1::2, 1::2]
    refs = (0.5 * (a + b + c + d), 0.5 * (-a + b - c + d),
            0.5 * (-a - b + c + d), 0.5 * (a - b - c + d))

    for got, ref in zip(outs, refs):
        assert got.shape == (N, C, H // 2, W // 2)
        assert got.dtype == x.dtype
        err = float(jnp.max(jnp.abs(got - ref)))
        assert err < 1e-5, err

    print("KERNEL_OK")
</pallas_src>

<mosaic_0001>
module attributes {stable_mosaic.version = 11 : i64} {
  func.func @_wavepool_kernel(%arg0: i32, %arg1: memref<32x32xf32, #tpu.memory_space<vmem>>, %arg2: memref<16x8xbf16, #tpu.memory_space<vmem>>, %arg3: memref<16x8xbf16, #tpu.memory_space<vmem>>, %arg4: memref<32x8xf32, #tpu.memory_space<vmem>>, %arg5: memref<32x8xf32, #tpu.memory_space<vmem>>, %arg6: memref<32x8xf32, #tpu.memory_space<vmem>>, %arg7: memref<32x8xf32, #tpu.memory_space<vmem>>) attributes {dimension_semantics = [#tpu.dimension_semantics<parallel>], iteration_bounds = array<i64: 2>, scalar_prefetch = 0 : i64, scratch_operands = 0 : i64, tpu.core_type = #tpu.core_type<tc>, window_params = [{transform_indices = @transform_0, window_bounds = array<i64: 32, 32>}, {pipeline_mode = #tpu.pipeline_mode<synchronous>, transform_indices = @transform_1, window_bounds = array<i64: 16, 8>}, {pipeline_mode = #tpu.pipeline_mode<synchronous>, transform_indices = @transform_2, window_bounds = array<i64: 16, 8>}, {transform_indices = @transform_3, window_bounds = array<i64: 32, 8>}, {transform_indices = @transform_4, window_bounds = array<i64: 32, 8>}, {transform_indices = @transform_5, window_bounds = array<i64: 32, 8>}, {transform_indices = @transform_6, window_bounds = array<i64: 32, 8>}]} {
    %c0 = arith.constant 0 : index
    %c0_0 = arith.constant 0 : index
    %0 = vector.load %arg1[%c0, %c0_0] : memref<32x32xf32, #tpu.memory_space<vmem>>, vector<32x16xf32>
    %c0_1 = arith.constant 0 : index
    %c16 = arith.constant 16 : index
    %1 = vector.load %arg1[%c0_1, %c16] : memref<32x32xf32, #tpu.memory_space<vmem>>, vector<32x16xf32>
    %2 = arith.addf %0, %1 : vector<32x16xf32>
    %3 = arith.subf %1, %0 : vector<32x16xf32>
    %4 = arith.truncf %2 : vector<32x16xf32> to vector<32x16xbf16>
    %5 = arith.extf %4 : vector<32x16xbf16> to vector<32x16xf32>
    %6 = arith.subf %2, %5 : vector<32x16xf32>
    %7 = arith.truncf %6 : vector<32x16xf32> to vector<32x16xbf16>
    %8 = arith.extf %7 : vector<32x16xbf16> to vector<32x16xf32>
    %9 = arith.subf %6, %8 : vector<32x16xf32>
    %10 = arith.truncf %9 : vector<32x16xf32> to vector<32x16xbf16>
    %11 = arith.truncf %3 : vector<32x16xf32> to vector<32x16xbf16>
    %12 = arith.extf %11 : vector<32x16xbf16> to vector<32x16xf32>
    %13 = arith.subf %3, %12 : vector<32x16xf32>
    %14 = arith.truncf %13 : vector<32x16xf32> to vector<32x16xbf16>
    %15 = arith.extf %14 : vector<32x16xbf16> to vector<32x16xf32>
    %16 = arith.subf %13, %15 : vector<32x16xf32>
    %17 = arith.truncf %16 : vector<32x16xf32> to vector<32x16xbf16>
    %c0_2 = arith.constant 0 : index
    %c0_3 = arith.constant 0 : index
    %18 = vector.load %arg2[%c0_2, %c0_3] : memref<16x8xbf16, #tpu.memory_space<vmem>>, vector<16x8xbf16>
    %c0_4 = arith.constant 0 : index
    %c0_5 = arith.constant 0 : index
    %19 = vector.load %arg3[%c0_4, %c0_5] : memref<16x8xbf16, #tpu.memory_space<vmem>>, vector<16x8xbf16>
    %cst = arith.constant dense<0.000000e+00> : vector<32x8xf32>
    %20 = tpu.matmul %4, %18, %cst {dimension_numbers = #tpu.dot_dimension_numbers<[1], [0], [0], [1], [0, 0, 1, 1], [], []>} : vector<32x16xbf16>, vector<16x8xbf16>, vector<32x8xf32> -> vector<32x8xf32>
    %cst_6 = arith.constant dense<0.000000e+00> : vector<32x8xf32>
    %21 = tpu.matmul %7, %18, %cst_6 {dimension_numbers = #tpu.dot_dimension_numbers<[1], [0], [0], [1], [0, 0, 1, 1], [], []>} : vector<32x16xbf16>, vector<16x8xbf16>, vector<32x8xf32> -> vector<32x8xf32>
    %22 = arith.addf %20, %21 : vector<32x8xf32>
    %cst_7 = arith.constant dense<0.000000e+00> : vector<32x8xf32>
    %23 = tpu.matmul %10, %18, %cst_7 {dimension_numbers = #tpu.dot_dimension_numbers<[1], [0], [0], [1], [0, 0, 1, 1], [], []>} : vector<32x16xbf16>, vector<16x8xbf16>, vector<32x8xf32> -> vector<32x8xf32>
    %24 = arith.addf %22, %23 : vector<32x8xf32>
    %c0_8 = arith.constant 0 : index
    %c0_9 = arith.constant 0 : index
    %25 = vector.load %arg4[%c0_8, %c0_9] : memref<32x8xf32, #tpu.memory_space<vmem>>, vector<32x8xf32>
    tpu.vector_store %arg4[%c0_8, %c0_9], %24 {strides = array<i32>} : memref<32x8xf32, #tpu.memory_space<vmem>>, vector<32x8xf32>,
    %cst_10 = arith.constant dense<0.000000e+00> : vector<32x8xf32>
    %26 = tpu.matmul %4, %19, %cst_10 {dimension_numbers = #tpu.dot_dimension_numbers<[1], [0], [0], [1], [0, 0, 1, 1], [], []>} : vector<32x16xbf16>, vector<16x8xbf16>, vector<32x8xf32> -> vector<32x8xf32>
    %cst_11 = arith.constant dense<0.000000e+00> : vector<32x8xf32>
    %27 = tpu.matmul %7, %19, %cst_11 {dimension_numbers = #tpu.dot_dimension_numbers<[1], [0], [0], [1], [0, 0, 1, 1], [], []>} : vector<32x16xbf16>, vector<16x8xbf16>, vector<32x8xf32> -> vector<32x8xf32>
    %28 = arith.addf %26, %27 : vector<32x8xf32>
    %cst_12 = arith.constant dense<0.000000e+00> : vector<32x8xf32>
    %29 = tpu.matmul %10, %19, %cst_12 {dimension_numbers = #tpu.dot_dimension_numbers<[1], [0], [0], [1], [0, 0, 1, 1], [], []>} : vector<32x16xbf16>, vector<16x8xbf16>, vector<32x8xf32> -> vector<32x8xf32>
    %30 = arith.addf %28, %29 : vector<32x8xf32>
    %c0_13 = arith.constant 0 : index
    %c0_14 = arith.constant 0 : index
    %31 = vector.load %arg5[%c0_13, %c0_14] : memref<32x8xf32, #tpu.memory_space<vmem>>, vector<32x8xf32>
    tpu.vector_store %arg5[%c0_13, %c0_14], %30 {strides = array<i32>} : memref<32x8xf32, #tpu.memory_space<vmem>>, vector<32x8xf32>,
    %cst_15 = arith.constant dense<0.000000e+00> : vector<32x8xf32>
    %32 = tpu.matmul %11, %18, %cst_15 {dimension_numbers = #tpu.dot_dimension_numbers<[1], [0], [0], [1], [0, 0, 1, 1], [], []>} : vector<32x16xbf16>, vector<16x8xbf16>, vector<32x8xf32> -> vector<32x8xf32>
    %cst_16 = arith.constant dense<0.000000e+00> : vector<32x8xf32>
    %33 = tpu.matmul %14, %18, %cst_16 {dimension_numbers = #tpu.dot_dimension_numbers<[1], [0], [0], [1], [0, 0, 1, 1], [], []>} : vector<32x16xbf16>, vector<16x8xbf16>, vector<32x8xf32> -> vector<32x8xf32>
    %34 = arith.addf %32, %33 : vector<32x8xf32>
    %cst_17 = arith.constant dense<0.000000e+00> : vector<32x8xf32>
    %35 = tpu.matmul %17, %18, %cst_17 {dimension_numbers = #tpu.dot_dimension_numbers<[1], [0], [0], [1], [0, 0, 1, 1], [], []>} : vector<32x16xbf16>, vector<16x8xbf16>, vector<32x8xf32> -> vector<32x8xf32>
    %36 = arith.addf %34, %35 : vector<32x8xf32>
    %c0_18 = arith.constant 0 : index
    %c0_19 = arith.constant 0 : index
    %37 = vector.load %arg6[%c0_18, %c0_19] : memref<32x8xf32, #tpu.memory_space<vmem>>, vector<32x8xf32>
    tpu.vector_store %arg6[%c0_18, %c0_19], %36 {strides = array<i32>} : memref<32x8xf32, #tpu.memory_space<vmem>>, vector<32x8xf32>,
    %cst_20 = arith.constant dense<0.000000e+00> : vector<32x8xf32>
    %38 = tpu.matmul %11, %19, %cst_20 {dimension_numbers = #tpu.dot_dimension_numbers<[1], [0], [0], [1], [0, 0, 1, 1], [], []>} : vector<32x16xbf16>, vector<16x8xbf16>, vector<32x8xf32> -> vector<32x8xf32>
    %cst_21 = arith.constant dense<0.000000e+00> : vector<32x8xf32>
    %39 = tpu.matmul %14, %19, %cst_21 {dimension_numbers = #tpu.dot_dimension_numbers<[1], [0], [0], [1], [0, 0, 1, 1], [], []>} : vector<32x16xbf16>, vector<16x8xbf16>, vector<32x8xf32> -> vector<32x8xf32>
    %40 = arith.addf %38, %39 : vector<32x8xf32>
    %cst_22 = arith.constant dense<0.000000e+00> : vector<32x8xf32>
    %41 = tpu.matmul %17, %19, %cst_22 {dimension_numbers = #tpu.dot_dimension_numbers<[1], [0], [0], [1], [0, 0, 1, 1], [], []>} : vector<32x16xbf16>, vector<16x8xbf16>, vector<32x8xf32> -> vector<32x8xf32>
    %42 = arith.addf %40, %41 : vector<32x8xf32>
    %c0_23 = arith.constant 0 : index
    %c0_24 = arith.constant 0 : index
    %43 = vector.load %arg7[%c0_23, %c0_24] : memref<32x8xf32, #tpu.memory_space<vmem>>, vector<32x8xf32>
    tpu.vector_store %arg7[%c0_23, %c0_24], %42 {strides = array<i32>} : memref<32x8xf32, #tpu.memory_space<vmem>>, vector<32x8xf32>,
    return
  }
  func.func @transform_0(%arg0: i32) -> (i32, i32) {
    %c0_i32 = arith.constant 0 : i32
    %c0_i32_0 = arith.constant 0 : i32
    return %arg0, %c0_i32 : i32, i32
  }
  func.func @transform_1(%arg0: i32) -> (i32, i32) {
    %c0_i32 = arith.constant 0 : i32
    %c0_i32_0 = arith.constant 0 : i32
    %c0_i32_1 = arith.constant 0 : i32
    return %c0_i32, %c0_i32_0 : i32, i32
  }
  func.func @transform_2(%arg0: i32) -> (i32, i32) {
    %c0_i32 = arith.constant 0 : i32
    %c0_i32_0 = arith.constant 0 : i32
    %c0_i32_1 = arith.constant 0 : i32
    return %c0_i32, %c0_i32_0 : i32, i32
  }
  func.func @transform_3(%arg0: i32) -> (i32, i32) {
    %c0_i32 = arith.constant 0 : i32
    %c0_i32_0 = arith.constant 0 : i32
    return %arg0, %c0_i32 : i32, i32
  }
  func.func @transform_4(%arg0: i32) -> (i32, i32) {
    %c0_i32 = arith.constant 0 : i32
    %c0_i32_0 = arith.constant 0 : i32
    return %arg0, %c0_i32 : i32, i32
  }
  func.func @transform_5(%arg0: i32) -> (i32, i32) {
    %c0_i32 = arith.constant 0 : i32
    %c0_i32_0 = arith.constant 0 : i32
    return %arg0, %c0_i32 : i32, i32
  }
  func.func @transform_6(%arg0: i32) -> (i32, i32) {
    %c0_i32 = arith.constant 0 : i32
    %c0_i32_0 = arith.constant 0 : i32
    return %arg0, %c0_i32 : i32, i32
  }
}

</mosaic_0001>

<bundles_post_ra>
// kernel: tpu_custom_call.1
= control target key start
LH: loop header
LB: loop body
LE: loop exit
PB: predicated region body
PF: predicated region fallthrough
CT: control target
= control target key end

     0   :  { %s1470_s21 = smov 0   ;;  %s1587_s0 = inlined_call_operand.vmem [shape: f32[64,32], index: 0, kind: input, shape index: {}]   ;;  %s1588_s1 = inlined_call_operand.vmem [shape: bf16[16,8], index: 1, kind: input, shape index: {}]   ;;  %s1589_s2 = inlined_call_operand.vmem [shape: bf16[16,8], index: 2, kind: input, shape index: {}]   ;;  %s1590_s3 = inlined_call_operand.vmem [shape: f32[64,8], index: 3, kind: output, shape index: {0}]   ;;  %s1591_s4 = inlined_call_operand.vmem [shape: f32[64,8], index: 4, kind: output, shape index: {1}]   ;;  %s1592_s5 = inlined_call_operand.vmem [shape: f32[64,8], index: 5, kind: output, shape index: {2}]   ;;  %s1593_s6 = inlined_call_operand.vmem [shape: f32[64,8], index: 6, kind: output, shape index: {3}]  }
   0x1 LB: > { %s1230_s22 = sadd.s32 4294967295, %s1431_s21   ;;  %p1234_p0 = scmp.ge.s32.totalorder %s1431_s21, 1  ;;  %s1431_s21 = sphi %s1470_s21, %s17_s21  }
   0x2   : > { %p220_p1 = scmp.lt.s32.totalorder %s1431_s21, 3 }
   0x4   : > { %p221_p2 = pnand %p1234_p0, %p220_p1 }
   0x5   : > { %s1235_s23 = sshll.u32 (!%p221_p2), %s1230_s22, 2  ;;  %s1433_s28 = smov (!%p221_p2), 16   ;;  %v1491_v4 = vld [vmem:[%s1588_s1] sm:$0xff] (!%p221_p2)   ;;  %vm390_vm0 = vcmask (!%p221_p2), 130048   ;;  %vm560_vm1 = vcmask (!%p221_p2), 64512  }
   0x6   : > { %224 = sbr.rel (%p221_p2) target bundleno = 502 (0x1f6), region = 32  ;;  %p266_p3 = scmp.lt.s32.totalorder (!%p221_p2), %s1235_s23, 7  ;;  %v1496_v5 = vld [vmem:[%s1589_s2] sm:$0xff] (!%p221_p2)   ;;  %1309 = vmatprep.subr.bf16.mxu0 (!%p221_p2), %v1491_v4 }
   0x7   : > { %s1434_s29 = smov (!%p221_p2), 112   ;;  %1327 = vmatprep.subr.bf16.mxu1 (!%p221_p2), %v1496_v5  ;;  %1310 = vmatpush3.bf16.msra.mxu0 (!%p221_p2), %v1491_v4 }
   0x8   : > { %1328 = vmatpush3.bf16.msra.mxu1 (!%p221_p2), %v1496_v5  ;;  %1315 = vmatprep.subr.bf16.mxu0 (!%p221_p2), %v1491_v4 }
   0x9   : > { %1333 = vmatprep.subr.bf16.mxu1 (!%p221_p2), %v1496_v5 }
   0xd   : > { %s1595_s23 = smov (!%p266_p3, %s1235_s23), 7 }
   0xe   : > { %s1478_s24 = sshll.u32 %s1595_s23, 3 }
   0xf   : > { %s269_s27 = scalar_lea.vmem %s1587_s0, %s1478_s24  ;;  %s275_s12 = scalar_lea.vmem %s1590_s3, %s1478_s24 }
  0x10   : > { %v298_v0 = vld [vmem:[%s269_s27 + $0x10] sm:$0xff]  ;;  %v296_v1 = vld [vmem:[%s269_s27] sm:$0xff]  ;;  %v299_v2 = vld [vmem:[%s269_s27 + $0x18] sm:$0xff]  ;;  %s281_s15 = scalar_lea.vmem %s1591_s4, %s1478_s24  ;;  %s287_s18 = scalar_lea.vmem %s1592_s5, %s1478_s24 }
  0x11   : > { %324 = vrot.lane.b32.xlu1 %v298_v0, %s1433_s28  ;;  %320 = vrot.lane.b32.xlu0 %v296_v1, %s1433_s28  ;;  %v297_v3 = vld [vmem:[%s269_s27 + $0x8] sm:$0xff]  ;;  %s293_s22 = scalar_lea.vmem %s1593_s6, %s1478_s24 }
  0x15   : > { %326 = vrot.lane.b32.xlu1 %v299_v2, %s1433_s28  ;;  %322 = vrot.lane.b32.xlu0 %v297_v3, %s1433_s28 }
  0x19   : > { %306 = vrot.lane.b32.xlu1 %v297_v3, %s1434_s29  ;;  %304 = vrot.lane.b32.xlu0 %v296_v1, %s1434_s29 }
  0x1d   : > { %310 = vrot.lane.b32.xlu1 %v299_v2, %s1434_s29  ;;  %308 = vrot.lane.b32.xlu0 %v298_v0, %s1434_s29 }
  0x83   : > { %v325_v6 = vpop.permute.xlu1 %324  ;;  %v321_v7 = vpop.permute.xlu0 %320 }
  0x84   : > { %v334_v10 = vsub.f32 %v298_v0, %v325_v6  ;;  %v332_v11 = vsub.f32 %v296_v1, %v321_v7 }
  0x87   : > { %v327_v8 = vpop.permute.xlu1 %326  ;;  %v323_v9 = vpop.permute.xlu0 %322 }
  0x88   : > { %v335_v12 = vsub.f32 %v299_v2, %v327_v8  ;;  %v333_v13 = vsub.f32 %v297_v3, %v323_v9 }
  0x8a   : > { %v359_v14 = vpack.c.bf16 %v335_v12, %v334_v10  ;;  %v358_v15 = vpack.c.bf16 %v333_v13, %v332_v11 }
  0x8b   : > { %v307_v16 = vpop.permute.xlu1 %306  ;;  %v305_v17 = vpop.permute.xlu0 %304 }
  0x8c   : > { %v362_v18 = vunpack.c.l.bf16 %v359_v14  ;;  %v363_v19 = vunpack.c.h.bf16 %v359_v14  ;;  %v360_v20 = vunpack.c.l.bf16 %v358_v15  ;;  %v361_v21 = vunpack.c.h.bf16 %v358_v15 }
  0x8d   : > { %v317_v22 = vadd.f32 %v307_v16, %v297_v3  ;;  %v316_v23 = vadd.f32 %v305_v17, %v296_v1 }
  0x8e   : > { %v367_v24 = vsub.f32 %v335_v12, %v363_v19  ;;  %v365_v25 = vsub.f32 %v333_v13, %v361_v21  ;;  %v366_v26 = vsub.f32 %v334_v10, %v362_v18  ;;  %v364_v27 = vsub.f32 %v332_v11, %v360_v20 }
  0x8f   : > { %v336_v28 = vpack.c.bf16 %v317_v22, %v316_v23  ;;  %v311_v29 = vpop.permute.xlu1 %310  ;;  %v309_v30 = vpop.permute.xlu0 %308 }
  0x90   : > { %v369_v31 = vpack.c.bf16 %v367_v24, %v366_v26  ;;  %v368_v32 = vpack.c.bf16 %v365_v25, %v364_v27  ;;  %v319_v33 = vadd.f32 %v311_v29, %v299_v2  ;;  %v318_v34 = vadd.f32 %v309_v30, %v298_v0 }
  0x91   : > { %v338_v35 = vunpack.c.l.bf16 %v336_v28  ;;  %v339_v36 = vunpack.c.h.bf16 %v336_v28 }
  0x92   : > { %730 = vrot.lane.b32.xlu1 %v369_v31, %s1434_s29  ;;  %728 = vrot.lane.b32.xlu0 %v368_v32, %s1434_s29  ;;  %v372_v37 = vunpack.c.l.bf16 %v369_v31  ;;  %v373_v38 = vunpack.c.h.bf16 %v369_v31  ;;  %v370_v39 = vunpack.c.l.bf16 %v368_v32  ;;  %v371_v40 = vunpack.c.h.bf16 %v368_v32 }
  0x93   : > { %v342_v41 = vsub.f32 %v316_v23, %v338_v35  ;;  %v343_v42 = vsub.f32 %v317_v22, %v339_v36  ;;  %v337_v43 = vpack.c.bf16 %v319_v33, %v318_v34 }
  0x94   : > { %v376_v44 = vsub.f32 %v366_v26, %v372_v37  ;;  %v377_v45 = vsub.f32 %v367_v24, %v373_v38  ;;  %v374_v46 = vsub.f32 %v364_v27, %v370_v39  ;;  %v375_v47 = vsub.f32 %v365_v25, %v371_v40 }
  0x95   : > { %v346_v48 = vpack.c.bf16 %v343_v42, %v342_v41  ;;  %v340_v49 = vunpack.c.l.bf16 %v337_v43  ;;  %v341_v50 = vunpack.c.h.bf16 %v337_v43 }
  0x96   : > { %791 = vrot.lane.b32.xlu1 %v359_v14, %s1434_s29  ;;  %789 = vrot.lane.b32.xlu0 %v358_v15, %s1434_s29  ;;  %v379_v53 = vpack.c.bf16 %v377_v45, %v376_v44  ;;  %v378_v54 = vpack.c.bf16 %v375_v47, %v374_v46 }
  0x97   : > { %v344_v51 = vsub.f32 %v318_v34, %v340_v49  ;;  %v345_v52 = vsub.f32 %v319_v33, %v341_v50  ;;  %1311 = vmatprep.mubr.msk.bf16.mxu0 %vm390_vm0, %v346_v48  ;;  %1329 = vmatprep.mubr.msk.bf16.mxu1 %vm390_vm0, %v346_v48  ;;  %v348_v56 = vunpack.c.l.bf16 %v346_v48  ;;  %v349_v57 = vunpack.c.h.bf16 %v346_v48 }
  0x99   : > { %v347_v55 = vpack.c.bf16 %v345_v52, %v344_v51  ;;  %v352_v58 = vsub.f32 %v342_v41, %v348_v56  ;;  %v353_v59 = vsub.f32 %v343_v42, %v349_v57 }
  0x9a   : > { %852 = vrot.lane.b32.xlu1 %v379_v53, %s1434_s29  ;;  %850 = vrot.lane.b32.xlu0 %v378_v54, %s1434_s29 }
  0x9b   : > { %1312 = vmatmul.mubr.msk.bf16.vlgmr.msra.gmra.mrb[0].mxu0 %vm390_vm0, %v347_v55  ;;  %1330 = vmatmul.mubr.msk.bf16.vlgmr.msra.gmra.mrb[0].mxu1 %vm390_vm0, %v347_v55  ;;  %v356_v60 = vpack.c.bf16 %v353_v59, %v352_v58  ;;  %v350_v61 = vunpack.c.l.bf16 %v347_v55  ;;  %v351_v62 = vunpack.c.h.bf16 %v347_v55 }
  0x9c   : > { %1316 = vmatpush3.bf16.msra.mxu0 %v1491_v4  ;;  %1334 = vmatpush3.bf16.msra.mxu1 %v1496_v5 }
  0x9d   : > { %1317 = vmatprep.mubr.msk.bf16.mxu0 %vm390_vm0, %v336_v28  ;;  %1335 = vmatprep.mubr.msk.bf16.mxu1 %vm390_vm0, %v336_v28  ;;  %v354_v63 = vsub.f32 %v344_v51, %v350_v61  ;;  %v355_v0 = vsub.f32 %v345_v52, %v351_v62 }
  0x9e   : > { %1321 = vmatprep.subr.bf16.mxu0 %v1491_v4  ;;  %1339 = vmatprep.subr.bf16.mxu1 %v1496_v5 }
  0x9f   : > { %v357_v1 = vpack.c.bf16 %v355_v0, %v354_v63 }
  0xa7   : > { %1318 = vmatmul.mubr.msk.bf16.vlgmr.msra.gmra.mrb[0].mxu0 %vm390_vm0, %v337_v43  ;;  %1336 = vmatmul.mubr.msk.bf16.vlgmr.msra.gmra.mrb[0].mxu1 %vm390_vm0, %v337_v43 }
  0xa8   : > { %1322 = vmatpush3.bf16.msra.mxu0 %v1491_v4  ;;  %1340 = vmatpush3.bf16.msra.mxu1 %v1496_v5 }
  0xa9   : > { %1323 = vmatprep.mubr.msk.bf16.mxu0 %vm390_vm0, %v356_v60  ;;  %1341 = vmatprep.mubr.msk.bf16.mxu1 %vm390_vm0, %v356_v60 }
  0xaa   : > { %1345 = vmatprep.subr.bf16.mxu0 %v1491_v4  ;;  %1363 = vmatprep.subr.bf16.mxu1 %v1496_v5 }
  0xb3   : > { %1324 = vmatmul.mubr.msk.bf16.vlgmr.msra.gmra.mrb[0].mxu0 %vm390_vm0, %v357_v1  ;;  %1342 = vmatmul.mubr.msk.bf16.vlgmr.msra.gmra.mrb[0].mxu1 %vm390_vm0, %v357_v1 }
  0xb4   : > { %1346 = vmatpush3.bf16.msra.mxu0 %v1491_v4  ;;  %1364 = vmatpush3.bf16.msra.mxu1 %v1496_v5 }
  0xb5   : > { %1351 = vmatprep.subr.bf16.mxu0 %v1491_v4  ;;  %1369 = vmatprep.subr.bf16.mxu1 %v1496_v5 }
 0x104   : > { %v731_v2 = vpop.permute.xlu1 %730  ;;  %v729_v3 = vpop.permute.xlu0 %728 }
 0x105   : > { %1347 = vmatprep.mubr.msk.bf16.mxu0 %vm390_vm0, %v729_v3  ;;  %1365 = vmatprep.mubr.msk.bf16.mxu1 %vm390_vm0, %v729_v3 }
 0x106   : > { %1348 = vmatmul.mubr.msk.bf16.vlgmr.msra.gmra.mrb[4].mxu0 %vm390_vm0, %v731_v2  ;;  %1366 = vmatmul.mubr.msk.bf16.vlgmr.msra.gmra.mrb[4].mxu1 %vm390_vm0, %v731_v2 }
 0x107   : > { %1352 = vmatpush3.bf16.msra.mxu0 %v1491_v4  ;;  %1370 = vmatpush3.bf16.msra.mxu1 %v1496_v5 }
 0x108   : > { %v790_v6 = vpop.permute.xlu0 %789  ;;  %1357 = vmatprep.subr.bf16.mxu0 %v1491_v4  ;;  %1375 = vmatprep.subr.bf16.mxu1 %v1496_v5  ;;  %v792_v7 = vpop.permute.xlu1 %791 }
 0x109   : > { %1353 = vmatprep.mubr.msk.bf16.mxu0 %vm390_vm0, %v790_v6  ;;  %1371 = vmatprep.mubr.msk.bf16.mxu1 %vm390_vm0, %v790_v6 }
 0x10c   : > { %v851_v8 = vpop.permute.xlu0 %850  ;;  %v853_v9 = vpop.permute.xlu1 %852 }
 0x112   : > { %1354 = vmatmul.mubr.msk.bf16.vlgmr.msra.gmra.mrb[4].mxu0 %vm390_vm0, %v792_v7  ;;  %1372 = vmatmul.mubr.msk.bf16.vlgmr.msra.gmra.mrb[4].mxu1 %vm390_vm0, %v792_v7 }
 0x113   : > { %1358 = vmatpush3.bf16.msra.mxu0 %v1491_v4  ;;  %1376 = vmatpush3.bf16.msra.mxu1 %v1496_v5 }
 0x114   : > { %1359 = vmatprep.mubr.msk.bf16.mxu0 %vm390_vm0, %v851_v8  ;;  %1377 = vmatprep.mubr.msk.bf16.mxu1 %vm390_vm0, %v851_v8 }
 0x11e   : > { %1360 = vmatmul.mubr.msk.bf16.vlgmr.msra.gmra.mrb[4].mxu0 %vm390_vm0, %v853_v9  ;;  %1378 = vmatmul.mubr.msk.bf16.vlgmr.msra.gmra.mrb[4].mxu1 %vm390_vm0, %v853_v9 }
 0x186   : > { %v1325_v4 = vpop.f32.mrb[0].mxu0  ;;  %v1343_v5 = vpop.f32.mrb[0].mxu1 }
 0x187   : > { %v541_v10 = vpop.f32.mrb[1].mxu0  ;;  %v703_v11 = vpop.f32.mrb[1].mxu1  ;;  %563 = vst.msk [vmem:[%s275_s12 + $0x10] sm:$0xff] %vm560_vm1, %v1325_v4  ;;  %724 = vst.msk [vmem:[%s281_s15 + $0x10] sm:$0xff] %vm560_vm1, %v1343_v5 }
 0x188   : > { %561 = vst.msk [vmem:[%s275_s12] sm:$0xff] %vm560_vm1, %v541_v10  ;;  %722 = vst.msk [vmem:[%s281_s15] sm:$0xff] %vm560_vm1, %v703_v11  ;;  %v1326_v12 = vpop.f32.mrb[2].mxu0  ;;  %v1344_v13 = vpop.f32.mrb[2].mxu1 }
 0x189   : > { %v544_v14 = vpop.f32.mrb[3].mxu0  ;;  %v706_v15 = vpop.f32.mrb[3].mxu1  ;;  %564 = vst.msk [vmem:[%s275_s12 + $0x18] sm:$0xff] %vm560_vm1, %v1326_v12  ;;  %725 = vst.msk [vmem:[%s281_s15 + $0x18] sm:$0xff] %vm560_vm1, %v1344_v13 }
 0x18a   : > { %562 = vst.msk [vmem:[%s275_s12 + $0x8] sm:$0xff] %vm560_vm1, %v544_v14  ;;  %723 = vst.msk [vmem:[%s281_s15 + $0x8] sm:$0xff] %vm560_vm1, %v706_v15 }
 0x1f1   : > { %v1361_v16 = vpop.f32.mrb[4].mxu0  ;;  %v1379_v17 = vpop.f32.mrb[4].mxu1 }
 0x1f2   : > { %v894_v18 = vpop.f32.mrb[5].mxu0  ;;  %v1049_v19 = vpop.f32.mrb[5].mxu1  ;;  %915 = vst.msk [vmem:[%s287_s18 + $0x10] sm:$0xff] %vm560_vm1, %v1361_v16  ;;  %1070 = vst.msk [vmem:[%s293_s22 + $0x10] sm:$0xff] %vm560_vm1, %v1379_v17 }
 0x1f3   : > { %913 = vst.msk [vmem:[%s287_s18] sm:$0xff] %vm560_vm1, %v894_v18  ;;  %1068 = vst.msk [vmem:[%s293_s22] sm:$0xff] %vm560_vm1, %v1049_v19  ;;  %v1362_v20 = vpop.f32.mrb[6].mxu0  ;;  %v1380_v21 = vpop.f32.mrb[6].mxu1 }
 0x1f4   : > { %v897_v22 = vpop.f32.mrb[7].mxu0  ;;  %v1052_v23 = vpop.f32.mrb[7].mxu1  ;;  %916 = vst.msk [vmem:[%s287_s18 + $0x18] sm:$0xff] %vm560_vm1, %v1362_v20  ;;  %1071 = vst.msk [vmem:[%s293_s22 + $0x18] sm:$0xff] %vm560_vm1, %v1380_v21 }
 0x1f5   : > { %914 = vst.msk [vmem:[%s287_s18 + $0x8] sm:$0xff] %vm560_vm1, %v897_v22  ;;  %1069 = vst.msk [vmem:[%s293_s22 + $0x8] sm:$0xff] %vm560_vm1, %v1052_v23 }
 0x1f6 PF: > { %s17_s21 = sadd.s32 1, %s1431_s21  }
 0x1f7   : > { %p14_p4 = scmp.ge.s32.totalorder %s17_s21, 4  }
 0x1f9   :  { %16 = sbr.rel (!%p14_p4) target bundleno = 1 (0x1), region = 98 }

</bundles_post_ra>
